<compile_context>
chip_gen: v7x
topology: tpu7x:2x2x1
jax: 0.10.0
libtpu: 0.0.40
codegen_flags: <defaults>
</compile_context>

<pallas_src>
import jax
import jax.numpy as jnp
from jax.experimental import pallas as pl
from jax.experimental.pallas import tpu as pltpu


def se_unit_kernel(x_ref, w1_ref, b1_ref, w2_ref, b2_ref, o_ref):
    # x_ref: (Nb, C, HW) tile, HW lane-dense.
    x = x_ref[...]                                                # (Nb, C, HW)
    # Squeeze: global average over spatial (lane axis), accumulate in f32.
    s = jnp.mean(x.astype(jnp.float32), axis=-1)                  # (Nb, C)
    # Excitation: fc1 -> ReLU -> fc2 -> ReLU (1x1 convs == dense layers),
    # batched over Nb so the matmuls aren't M=1 vector-matrix ops.
    h = jnp.dot(s, w1_ref[...], preferred_element_type=jnp.float32) + b1_ref[...]
    h = jnp.maximum(h, 0.0)                                       # (Nb, hidden)
    g = jnp.dot(h, w2_ref[...], preferred_element_type=jnp.float32) + b2_ref[...]
    g = jnp.maximum(g, 0.0)                                       # (Nb, C)
    # Scale: per-(batch, channel) gate broadcast over lanes, in x's dtype
    # (no second f32 copy of the big tile).
    o_ref[...] = x * g.astype(x.dtype)[:, :, None]


def _pick_batch_block(n, per_elem_bytes, vmem_budget=16 * 1024 * 1024):
    """Largest divisor of n whose double-buffered in+out blocks fit the budget,
    while keeping >= 2 grid steps so both v7x TensorCores stay busy."""
    best = 1
    for nb in range(1, min(n, 8) + 1):
        if n % nb != 0:
            continue
        steps = n // nb
        if steps < 2 and n >= 2:
            continue
        if 4 * nb * per_elem_bytes <= vmem_budget:  # 2x in + 2x out buffers
            best = nb
    return best


def se_unit_pallas(x_nchw, w1, b1, w2, b2):
    """x_nchw: (N, C, H, W). w1: (C, hidden), b1: (1, hidden),
    w2: (hidden, C), b2: (1, C).  Returns (N, C, H, W)."""
    N, C, H, W = x_nchw.shape
    HW = H * W
    hidden = w1.shape[1]

    # Free reshape (merge trailing dims) -- no transpose, no extra HBM traffic.
    x = x_nchw.reshape(N, C, HW)

    per_elem_bytes = C * HW * x.dtype.itemsize
    nb = _pick_batch_block(N, per_elem_bytes)
    grid = (N // nb,)

    block_bytes = nb * per_elem_bytes
    param_bytes = w1.nbytes + b1.nbytes + w2.nbytes + b2.nbytes
    # Keep the scoped-VMEM limit comfortably above what we use, but below
    # v7x's 64 MiB physical VMEM (also raises v5e's 16 MiB default).
    needed = 4 * block_bytes + param_bytes + (2 << 20)
    vmem_limit = int(min(max(needed, 32 << 20), 56 << 20))

    cost = pl.CostEstimate(
        flops=int(N * (2 * C * HW + 4 * C * hidden)),
        transcendentals=0,
        bytes_accessed=int(2 * x.nbytes + param_bytes),
    )

    out = pl.pallas_call(
        se_unit_kernel,
        out_shape=jax.ShapeDtypeStruct((N, C, HW), x.dtype),
        grid_spec=pltpu.PrefetchScalarGridSpec(
            num_scalar_prefetch=0,
            grid=grid,
            in_specs=[
                pl.BlockSpec((nb, C, HW), lambda n: (n, 0, 0)),
                # Constant index maps: weights/biases stay VMEM-resident.
                pl.BlockSpec((C, hidden), lambda n: (0, 0)),
                pl.BlockSpec((1, hidden), lambda n: (0, 0)),
                pl.BlockSpec((hidden, C), lambda n: (0, 0)),
                pl.BlockSpec((1, C), lambda n: (0, 0)),
            ],
            out_specs=pl.BlockSpec((nb, C, HW), lambda n: (n, 0, 0)),
        ),
        compiler_params=pltpu.CompilerParams(
            dimension_semantics=("parallel",),
            vmem_limit_bytes=vmem_limit,
        ),
        # Each grid step reads and writes the same (nb, C, HW) slice, so the
        # output can alias x's HBM buffer (no second activation buffer).
        input_output_aliases={0: 0},
        cost_estimate=cost,
    )(x, w1, b1, w2, b2)

    return out.reshape(N, C, H, W)


def se_unit_ref(x_nchw, w1, b1, w2, b2):
    """Pure-JAX reference mirroring the PyTorch forward (NCHW, act=ReLU)."""
    s = jnp.mean(x_nchw, axis=(2, 3))                      # (N, C)
    h = jnp.maximum(s @ w1 + b1, 0.0)                      # (N, hidden)
    g = jnp.maximum(h @ w2 + b2, 0.0)                      # (N, C)
    return x_nchw * g[:, :, None, None]


if __name__ == "__main__":
    # Small shapes consistent with the module: N=2, C=16, H=W=16, reduction=4.
    N, C, H, W = 2, 16, 16, 16
    reduction_ratio = 4
    hidden = C // reduction_ratio

    key = jax.random.PRNGKey(0)
    kx, k1, k2, k3, k4 = jax.random.split(key, 5)

    x = jax.random.normal(kx, (N, C, H, W), dtype=jnp.float32)

    # nn.Conv2d(C, hidden, 1) weights, stored pre-transposed for matmul: (in, out).
    w1 = jax.random.normal(k1, (C, hidden), dtype=jnp.float32) * 0.1
    b1 = jax.random.normal(k2, (1, hidden), dtype=jnp.float32) * 0.1
    w2 = jax.random.normal(k3, (hidden, C), dtype=jnp.float32) * 0.1
    b2 = jax.random.normal(k4, (1, C), dtype=jnp.float32) * 0.1

    ref = jax.block_until_ready(se_unit_ref(x, w1, b1, w2, b2))
    out = jax.block_until_ready(se_unit_pallas(x, w1, b1, w2, b2))

    assert out.shape == (N, C, H, W)
    assert jnp.allclose(out, ref, atol=1e-5, rtol=1e-5)
    print("KERNEL_OK")
</pallas_src>

<mosaic_0001>
module attributes {stable_mosaic.version = 11 : i64} {
  func.func @se_unit_kernel(%arg0: i32, %arg1: memref<1x16x256xf32, #tpu.memory_space<vmem>>, %arg2: memref<16x4xf32, #tpu.memory_space<vmem>>, %arg3: memref<1x4xf32, #tpu.memory_space<vmem>>, %arg4: memref<4x16xf32, #tpu.memory_space<vmem>>, %arg5: memref<1x16xf32, #tpu.memory_space<vmem>>, %arg6: memref<1x16x256xf32, #tpu.memory_space<vmem>>) attributes {dimension_semantics = [#tpu.dimension_semantics<parallel>], iteration_bounds = array<i64: 2>, scalar_prefetch = 0 : i64, scratch_operands = 0 : i64, tpu.core_type = #tpu.core_type<tc>, window_params = [{transform_indices = @transform_0, window_bounds = array<i64: 1, 16, 256>}, {pipeline_mode = #tpu.pipeline_mode<synchronous>, transform_indices = @transform_1, window_bounds = array<i64: 16, 4>}, {pipeline_mode = #tpu.pipeline_mode<synchronous>, transform_indices = @transform_2, window_bounds = array<i64: 1, 4>}, {pipeline_mode = #tpu.pipeline_mode<synchronous>, transform_indices = @transform_3, window_bounds = array<i64: 4, 16>}, {pipeline_mode = #tpu.pipeline_mode<synchronous>, transform_indices = @transform_4, window_bounds = array<i64: 1, 16>}, {transform_indices = @transform_5, window_bounds = array<i64: 1, 16, 256>}]} {
    %c0 = arith.constant 0 : index
    %c0_0 = arith.constant 0 : index
    %c0_1 = arith.constant 0 : index
    %0 = vector.load %arg1[%c0, %c0_0, %c0_1] : memref<1x16x256xf32, #tpu.memory_space<vmem>>, vector<1x16x256xf32>
    %cst = arith.constant dense<0.000000e+00> : vector<1x16xf32>
    %1 = vector.multi_reduction <add>, %0, %cst [2] : vector<1x16x256xf32> to vector<1x16xf32>
    %cst_2 = arith.constant 2.560000e+02 : f32
    %2 = vector.broadcast %cst_2 : f32 to vector<1x16xf32>
    %3 = arith.divf %1, %2 : vector<1x16xf32>
    %c0_3 = arith.constant 0 : index
    %c0_4 = arith.constant 0 : index
    %4 = vector.load %arg2[%c0_3, %c0_4] : memref<16x4xf32, #tpu.memory_space<vmem>>, vector<16x4xf32>
    %cst_5 = arith.constant dense<0.000000e+00> : vector<1x4xf32>
    %5 = tpu.matmul %3, %4, %cst_5 {dimension_numbers = #tpu.dot_dimension_numbers<[1], [0], [0], [1], [0, 0, 1, 1], [], []>} : vector<1x16xf32>, vector<16x4xf32>, vector<1x4xf32> -> vector<1x4xf32>
    %c0_6 = arith.constant 0 : index
    %c0_7 = arith.constant 0 : index
    %6 = vector.load %arg3[%c0_6, %c0_7] : memref<1x4xf32, #tpu.memory_space<vmem>>, vector<1x4xf32>
    %7 = arith.addf %5, %6 : vector<1x4xf32>
    %cst_8 = arith.constant 0.000000e+00 : f32
    %8 = vector.broadcast %cst_8 : f32 to vector<1x4xf32>
    %9 = arith.maximumf %7, %8 : vector<1x4xf32>
    %c0_9 = arith.constant 0 : index
    %c0_10 = arith.constant 0 : index
    %10 = vector.load %arg4[%c0_9, %c0_10] : memref<4x16xf32, #tpu.memory_space<vmem>>, vector<4x16xf32>
    %cst_11 = arith.constant dense<0.000000e+00> : vector<1x16xf32>
    %11 = tpu.matmul %9, %10, %cst_11 {dimension_numbers = #tpu.dot_dimension_numbers<[1], [0], [0], [1], [0, 0, 1, 1], [], []>} : vector<1x4xf32>, vector<4x16xf32>, vector<1x16xf32> -> vector<1x16xf32>
    %c0_12 = arith.constant 0 : index
    %c0_13 = arith.constant 0 : index
    %12 = vector.load %arg5[%c0_12, %c0_13] : memref<1x16xf32, #tpu.memory_space<vmem>>, vector<1x16xf32>
    %13 = arith.addf %11, %12 : vector<1x16xf32>
    %cst_14 = arith.constant 0.000000e+00 : f32
    %14 = vector.broadcast %cst_14 : f32 to vector<1x16xf32>
    %15 = arith.maximumf %13, %14 : vector<1x16xf32>
    %16 = vector.shape_cast %15 : vector<1x16xf32> to vector<1x16x1xf32>
    %17 = vector.broadcast %16 : vector<1x16x1xf32> to vector<1x16x256xf32>
    %18 = arith.mulf %0, %17 : vector<1x16x256xf32>
    %c0_15 = arith.constant 0 : index
    %c0_16 = arith.constant 0 : index
    %c0_17 = arith.constant 0 : index
    %19 = vector.load %arg6[%c0_15, %c0_16, %c0_17] : memref<1x16x256xf32, #tpu.memory_space<vmem>>, vector<1x16x256xf32>
    tpu.vector_store %arg6[%c0_15, %c0_16, %c0_17], %18 {strides = array<i32>} : memref<1x16x256xf32, #tpu.memory_space<vmem>>, vector<1x16x256xf32>,
    return
  }
  func.func @transform_0(%arg0: i32) -> (i32, i32, i32) {
    %c0_i32 = arith.constant 0 : i32
    %c0_i32_0 = arith.constant 0 : i32
    %c0_i32_1 = arith.constant 0 : i32
    return %arg0, %c0_i32, %c0_i32_0 : i32, i32, i32
  }
  func.func @transform_1(%arg0: i32) -> (i32, i32) {
    %c0_i32 = arith.constant 0 : i32
    %c0_i32_0 = arith.constant 0 : i32
    %c0_i32_1 = arith.constant 0 : i32
    return %c0_i32, %c0_i32_0 : i32, i32
  }
  func.func @transform_2(%arg0: i32) -> (i32, i32) {
    %c0_i32 = arith.constant 0 : i32
    %c0_i32_0 = arith.constant 0 : i32
    %c0_i32_1 = arith.constant 0 : i32
    return %c0_i32, %c0_i32_0 : i32, i32
  }
  func.func @transform_3(%arg0: i32) -> (i32, i32) {
    %c0_i32 = arith.constant 0 : i32
    %c0_i32_0 = arith.constant 0 : i32
    %c0_i32_1 = arith.constant 0 : i32
    return %c0_i32, %c0_i32_0 : i32, i32
  }
  func.func @transform_4(%arg0: i32) -> (i32, i32) {
    %c0_i32 = arith.constant 0 : i32
    %c0_i32_0 = arith.constant 0 : i32
    %c0_i32_1 = arith.constant 0 : i32
    return %c0_i32, %c0_i32_0 : i32, i32
  }
  func.func @transform_5(%arg0: i32) -> (i32, i32, i32) {
    %c0_i32 = arith.constant 0 : i32
    %c0_i32_0 = arith.constant 0 : i32
    %c0_i32_1 = arith.constant 0 : i32
    return %arg0, %c0_i32, %c0_i32_0 : i32, i32, i32
  }
}

</mosaic_0001>

<bundles_post_ra>
// kernel: tpu_custom_call.1
= control target key start
LH: loop header
LB: loop body
LE: loop exit
PB: predicated region body
PF: predicated region fallthrough
CT: control target
= control target key end

     0   :  { %10 = vsyncpa [#allocation3], 0  ;;  %s949_s0 = inlined_call_operand.hbm [shape: f32[2,16,256], index: 0, kind: input, shape index: {}, may-alias: {0,5}]   ;;  %s950_s1 = inlined_call_operand.vmem [shape: f32[16,4], index: 1, kind: input, shape index: {}]   ;;  %s951_s2 = inlined_call_operand.vmem [shape: f32[1,4], index: 2, kind: input, shape index: {}]   ;;  %s952_s3 = inlined_call_operand.vmem [shape: f32[4,16], index: 3, kind: input, shape index: {}]   ;;  %s953_s4 = inlined_call_operand.vmem [shape: f32[1,16], index: 4, kind: input, shape index: {}]   ;;  %s954_s5 = inlined_call_operand.hbm [shape: f32[2,16,256], index: 5, kind: output, shape index: {}, may-alias: {0,5}]  }
   0x1   :  { %12 = vsyncpa [#allocation3 + $0x1], 0 }
   0x2   :  { %13 = vsyncpa [#allocation4], 0 }
   0x3   :  { %15 = vsyncpa [#allocation4 + $0x1], 0  ;;  %s764_s18 = smov 0   ;;  %s766_s19 = smov 0  }
   0x4   :  { %s768_s20 = smov 0   ;;  %s770_s21 = smov 0  }
   0x5 LB: > { %s785_s22 = sadd.s32 4294967295, %s723_s21   ;;  %s535_s23 = sadd.s32 4294967294, %s723_s21   ;;  %s723_s21 = sphi %s770_s21, %s967_s21   ;;  %s719_s20 = sphi %s768_s20, %s966_s20   ;;  %s715_s19 = sphi %s766_s19, %s965_s19   ;;  %s711_s18 = sphi %s764_s18, %s964_s18  }
   0x6   : > { %s789_s24 = sadd.s32 1, %s723_s21   ;;  %s28_s25 = sadd.s32 1, %s719_s20 }
   0x7   : > { %s25_s26 = ssub.s32 %s723_s21, %s789_s24  ;;  %p35_p0 = scmp.ne.s32.totalorder %s719_s20, %s715_s19 }
   0x8   : > { %p26_p1 = scmp.eq.s32.totalorder %s25_s26, 0  ;;  %p36_p2 = scmp.eq.s32.totalorder %s723_s21, 0 }
   0x9   : > { %p41_p3 = scmp.ne.s32.totalorder %s715_s19, %s711_s18  ;;  %p42_p4 = scmp.eq.s32.totalorder %s785_s22, 0 }
   0xa   : > { %s801_s27 = scalar_select %p26_p1, %s719_s20, %s28_s25  }
   0xb   : > { %p803_p5 = por %p36_p2, %p35_p0  ;;  %p807_p6 = por %p42_p4, %p41_p3 }
   0xc   : > { %p149_p7 = scmp.eq.s32.totalorder %s785_s22, 1  ;;  %p155_p8 = scmp.eq.s32.totalorder %s535_s23, 1 }
   0xd   : > { %p586_p10 = scmp.lt.s32.totalorder %s723_s21, 2  ;;  %s187_s7 = sand.u32 1, %s719_s20  }
   0xe   : > { %p814_p11 = por %p149_p7, %p35_p0  ;;  %p818_p12 = por %p155_p8, %p41_p3 }
   0xf   : > { %s552_s8 = sshll.u32 %s723_s21, 9  ;;  %s538_s9 = sshll.u32 %s187_s7, 5 }
  0x10   : > { %s958_s30 = scalar_select %p814_p11, 1, 0 }
  0x11   : > { %s959_s6 = scalar_select %p818_p12, 1, 0 }
  0x12   : > { %s827_s12 = scalar_lea.hbm %s949_s0, %s552_s8  ;;  %s191_s13 = scalar_lea.vmem [#allocation2], %s538_s9 }
  0x13   : > { %s198_s14 = sshll.u32 %s191_s13, 4  ;;  %p831_p13 = pnand %p586_p10, %p803_p5  ;;  %s835_s14 = int_to_ptr.vmem [resolvable:$true] %s198_s14 }
  0x14   : > { %s837_s16 = scalar_lea.sflag [#allocation3], %s187_s7  ;;  %s627_s17 = scalar_lea.hbm %s827_s12, 512 }
  0x15   : > { %p628_p0 = scmp.ne.s32.totalorder %s827_s12, %s627_s17  ;;  %p629_p1 = pneg %p831_p13 }
  0x16   : > { %s632_s26 = scalar_lea.hbm %s949_s0, 1024  ;;  %p633_p4 = scmp.lt.u32.totalorder %s827_s12, %s949_s0 }
  0x17   : > { %p630_p2 = pnand %p629_p1, %p628_p0  ;;  %p634_p5 = scmp.lt.u32.totalorder %s632_s26, %s627_s17 }
  0x18   : > { %p636_p8 = scmp.lt.u32.totalorder %s627_s17, %s827_s12 }
  0x19   : > { %p631_p3 = pneg %p630_p2  ;;  %p635_p7 = por %p634_p5, %p633_p4 }
  0x1b   : > { %p637_p10 = por %p636_p8, %p635_p7 }
  0x1d   : > { %p638_p9 = pnand %p637_p10, %p631_p3 }
  0x1f   : > { %641 = shalt.err (!%p638_p9)
}
  0x20   : > { %s642_s7 = scalar_lea.vmem %s835_s14, 512  ;;  %s725_s9 = smov [#allocation2]  }
  0x21   : > { %p643_p0 = scmp.ne.s32.totalorder %s835_s14, %s642_s7  ;;  %s647_s10 = sshll.u32 %s725_s9, 4  ;;  %s648_s10 = int_to_ptr.vmem [resolvable:$false] %s647_s10 }
  0x22   : > { %s649_s11 = scalar_lea.vmem %s648_s10, 1024  ;;  %p650_p11 = scmp.lt.s32.totalorder %s835_s14, %s648_s10 }
  0x23   : > { %p645_p2 = pnand %p643_p0, %p629_p1  ;;  %p651_p4 = scmp.lt.s32.totalorder %s649_s11, %s642_s7 }
  0x25   : > { %p646_p12 = pneg %p645_p2  ;;  %p652_p5 = por %p651_p4, %p650_p11 }
  0x27   : > { %p653_p7 = pnand %p652_p5, %p646_p12 }
  0x29   : > { %656 = shalt.err (!%p653_p7)
}
  0x2a   : > { %s726_s13 = smov 256   ;;  %s727_s17 = smov 16  }
  0x2b   : > { %581 = dma.hbm_to_vmem [thread:$0]  (!%p831_p13), %s827_s12, 512, %s835_s14, %s837_s16, %s726_s13, %s726_s13, %s727_s17  }
  0x2c   : > { %p541_p9 = scmp.ge.s32.totalorder %s723_s21, 1  ;;  %p206_p1 = scmp.lt.s32.totalorder %s723_s21, 3 }
  0x2e   : > { %p207_p3 = pnand %p541_p9, %p206_p1 }
  0x2f   : > { %s868_s23 = sand.u32 (!%p207_p3), 1, %s715_s19  }
  0x30   : > { %210 = sbr.rel (%p207_p3) target bundleno = 780 (0x30c), region = 40  ;;  %s542_s25 = sshll.u32 (!%p207_p3), %s868_s23, 5 }
  0x31   : > { %s213_s26 = scalar_lea.sflag (!%p207_p3), [#allocation3], %s868_s23  ;;  %s216_s28 = scalar_lea.vmem (!%p207_p3), [#allocation2], %s542_s25 }
  0x37   : > { %702 = dma.done.wait (%p807_p6), %s213_s26, 512  }
  0x38   : > { %704 = vsyncadd (%p807_p6), %s213_s26, 4294966784  ;;  %v243_v0 = vld [vmem:[%s216_s28] sm:$0xff]  ;;  %v244_v1 = vld [vmem:[%s216_s28 + $0x8] sm:$0xff]  ;;  %v728_v9 = vmov 0.0|0.0   ;;  %vm729_vm0 = vmmov 0   ;;  %v730_v10 = vmov 0.0   ;;  %v261_v11 = vlaneseq }
  0x39   : > { %v878_v2 = vld [vmem:[%s216_s28 + $0x10] sm:$0xff]  ;;  %v247_v3 = vadd.f32 %v244_v1, %v243_v0  ;;  %v246_v4 = vld [vmem:[%s216_s28 + $0x18] sm:$0xff]  ;;  %v256_v6 = vld [vmem:[%s950_s1] sm:$0xff]  ;;  %571 = vmatprep.subr.bf16.mxu0 %v728_v9  ;;  %563 = vmatprep.mubr.msk.f32.mxu0 %vm729_vm0, %v730_v10  ;;  %vm272_vm1 = vcmask 130112   ;;  %vm274_vm2 = vcmask 130048   ;;  %vm354_vm3 = vcmask 1043456  }
  0x3a   : > { %v250_v5 = vadd.f32 %v246_v4, %v878_v2  ;;  %v257_v7 = vld [vmem:[%s950_s1 + $0x8] sm:$0xff]  ;;  %566 = vmatprep.subr.mxu1 %v730_v10  ;;  %568 = vmatprep.mubr.msk.f32.mxu1 %vm729_vm0, %v730_v10  ;;  %v262_v12 = vand.u32 127, %v261_v11  ;;  %v264_v13 = vshrl.u32 %v261_v11, 7  ;;  %v348_v24 = vld [vmem:[%s952_s3] sm:$0xf]  ;;  %vm350_vm4 = vcmask 31744  }
  0x3b   : > { %248 = vadd.xlane.f32.xlu0 %v247_v3  ;;  %v572_v8 = vpack.c.bf16 %v257_v7, %v256_v6  ;;  %567 = vmatpush3.msk.msra.mxu1 %vm354_vm3, %v348_v24  ;;  %v258_v25 = vld [vmem:[%s951_s2] sm:$0x1]  ;;  %s242_s13 = scalar_lea.vmem [#allocation5], %s542_s25  ;;  %s553_s26 = sshll.u32 %s785_s22, 9 }
  0x3c   : > { %v267_v14 = vadd.s32 4294967288, %v262_v12  ;;  %v265_v16 = vsub.s32 %v262_v12, %v264_v13  ;;  %v349_v30 = vld [vmem:[%s953_s4] sm:$0x1]  ;;  %v431_v34 = vsub.s32 0, %v264_v13  ;;  %s462_s17 = sshll.u32 %s242_s13, 4  ;;  %s904_s14 = scalar_lea.hbm %s954_s5, %s553_s26  ;;  %s899_s17 = int_to_ptr.vmem [resolvable:$true] %s462_s17 }
  0x3d   : > { %573 = vmatpush3.bf16.msra.mxu0 %v572_v8  ;;  %s449_s25 = scalar_lea.sflag [#allocation4], %s868_s23  ;;  %s657_s22 = scalar_lea.vmem %s899_s17, 512 }
  0x3e   : > { %v270_v18 = vsub.s32 %v267_v14, %v264_v13  ;;  %p658_p6 = scmp.ne.s32.totalorder %s899_s17, %s657_s22  ;;  %p961_p11 = scmp.ne.s32.totalorder %s958_s30, 0 }
  0x3f   : > { %251 = vadd.xlane.f32.xlu0 %v250_v5  ;;  %s731_s15 = smov [#allocation5]  }
  0x40   : > { %p659_p12 = pnand %p658_p6, %p961_p11  ;;  %s661_s16 = sshll.u32 %s731_s15, 4  ;;  %s662_s16 = int_to_ptr.vmem [resolvable:$false] %s661_s16 }
  0x41   : > { %s663_s29 = scalar_lea.vmem %s662_s16, 1024  ;;  %p664_p8 = scmp.lt.s32.totalorder %s899_s17, %s662_s16 }
  0x42   : > { %p660_p13 = pneg %p659_p12  ;;  %p665_p10 = scmp.lt.s32.totalorder %s663_s29, %s657_s22 }
  0x44   : > { %p666_p0 = por %p665_p10, %p664_p8 }
  0x46   : > { %p667_p2 = pnand %p666_p0, %p660_p13 }
  0xc8   : > { %v249_v15 = vpop.xlane.xlu0 %248 }
  0xc9   : > { %v254_v17 = vmul.f32 0.00390625, %v249_v15 }
  0xcb   : > { %v266_v21 = vrot.slane %v254_v17, %v265_v16 }
  0xcc   : > { %v252_v19 = vpop.xlane.xlu0 %251 }
  0xcd   : > { %v255_v20 = vmul.f32 0.00390625, %v252_v19 }
  0xcf   : > { %v271_v22 = vrot.slane %v255_v20, %v270_v18 }
  0xd1   : > { %v273_v23 = vsel %vm272_vm1, %v271_v22, %v266_v21 }
  0xd2   : > { %564 = vmatmul.mubr.msk.f32.vlgmr.msra.gmra.mrb[0].mxu0 %vm274_vm2, %v273_v23 }
 0x1a5   : > { %v343_v26 = vpop.f32.mrb[0].mxu0 }
 0x1a6   : > { %v344_v27 = vadd.f32 %v343_v26, %v258_v25  ;;  %v565_v28 = vpop.f32.mrb[1].mxu0 }
 0x1a8   : > { %v347_v29 = vmax.f32 %v344_v27, 0.0 }
 0x1aa   : > { %569 = vmatmul.mubr.msk.f32.vlgmr.msra.gmra.mrb[0].mxu1 %vm350_vm4, %v347_v29 }
 0x27d   : > { %v424_v31 = vpop.f32.mrb[0].mxu1 }
 0x27e   : > { %v425_v32 = vadd.f32 %v424_v31, %v349_v30  ;;  %v570_v33 = vpop.f32.mrb[1].mxu1 }
 0x280   : > { %v428_v35 = vmax.f32 %v425_v32, 0.0 }
 0x282   : > { %v432_v36 = vrot.slane %v428_v35, %v431_v34 }
 0x284   : > { %434 = vbcast.lane.b32.xlu1 %v432_v36, 256 }
 0x288   : > { %438 = vbcast.lane.b32.xlu1 %v432_v36, 264 }
 0x2f6   : > { %v435_v37 = vpop.permute.xlu1 %434 }
 0x2f7   : > { %v440_v38 = vmul.f32 %v435_v37, %v243_v0  ;;  %v441_v39 = vmul.f32 %v435_v37, %v244_v1 }
 0x2f9   : > { %444 = vst [vmem:[%s242_s13] sm:$0xff] %v440_v38  ;;  %445 = vst [vmem:[%s242_s13 + $0x8] sm:$0xff] %v441_v39 }
 0x2fa   : > { %v439_v40 = vpop.permute.xlu1 %438 }
 0x2fb   : > { %v442_v41 = vmul.f32 %v439_v40, %v878_v2  ;;  %v443_v42 = vmul.f32 %v439_v40, %v246_v4 }
 0x2fd   : > { %446 = vst [vmem:[%s242_s13 + $0x10] sm:$0xff] %v442_v41  ;;  %447 = vst [vmem:[%s242_s13 + $0x18] sm:$0xff] %v443_v42 }
 0x2fe   : > { %670 = shalt.err (!%p667_p2)
}
 0x2ff   : > { %s671_s8 = scalar_lea.hbm %s904_s14, 512  ;;  %s675_s10 = scalar_lea.hbm %s954_s5, 1024 }
 0x300   : > { %p672_p4 = scmp.ne.s32.totalorder %s904_s14, %s671_s8  ;;  %p676_p9 = scmp.lt.u32.totalorder %s904_s14, %s954_s5 }
 0x301   : > { %p677_p1 = scmp.lt.u32.totalorder %s675_s10, %s671_s8  ;;  %p679_p6 = scmp.lt.u32.totalorder %s671_s8, %s904_s14 }
 0x302   : > { %p673_p5 = pnand %p672_p4, %p961_p11 }
 0x303   : > { %p678_p3 = por %p677_p1, %p676_p9 }
 0x304   : > { %p674_p7 = pneg %p673_p5 }
 0x305   : > { %p680_p12 = por %p679_p6, %p678_p3 }
 0x307   : > { %p681_p13 = pnand %p680_p12, %p674_p7 }
 0x309   : > { %684 = shalt.err (!%p681_p13)
}
 0x30a   : > { %s732_s26 = smov 256   ;;  %s733_s28 = smov 16  }
 0x30b   : > { %576 = dma.vmem_to_hbm [thread:$0]  (%p961_p11), %s899_s17, 512, %s904_s14, %s449_s25, %s732_s26, %s732_s26, %s733_s28  }
 0x30c PF: > { %s477_s12 = sand.u32 1, %s711_s18   ;;  %p962_p8 = scmp.ne.s32.totalorder %s959_s6, 0 }
 0x30d   : > { %p963_p10 = scmp.ge.s32.totalorder %s723_s21, 2  ;;  %s478_s22 = scalar_lea.sflag [#allocation4], %s477_s12 }
 0x30f   : > { %p583_p0 = pnand %p963_p10, %p962_p8 }
 0x311   : > { %706 = dma.done.wait (!%p583_p0), %s478_s22, 512  }
 0x312   : > { %708 = vsyncadd (!%p583_p0), %s478_s22, 4294966784  ;;  %p18_p2 = scmp.ge.s32.totalorder %s789_s24, 4   ;;  %s964_s18 = smov %s715_s19 }
 0x313   : > { %s965_s19 = smov %s719_s20  ;;  %s966_s20 = smov %s801_s27 }
 0x314   : > { %s967_s21 = smov %s789_s24  ;;  %20 = sbr.rel (!%p18_p2) target bundleno = 5 (0x5), region = 85 }
 0x31b   :  { %483 = vsyncpa [#allocation3], 1 }
 0x31c   :  { %485 = vsyncpa [#allocation3 + $0x1], 1 }
 0x31d   :  { %486 = vsyncpa [#allocation4], 1 }
 0x31e   :  { %488 = vsyncpa [#allocation4 + $0x1], 1 }

</bundles_post_ra>
